<compile_context>
chip_gen: v5e
topology: v5e:2x2
jax: 0.10.0
libtpu: 0.0.40
codegen_flags: <defaults>
</compile_context>

<pallas_src>
import jax
import jax.numpy as jnp
from jax.experimental import pallas as pl
from jax.experimental.pallas import tpu as pltpu


_VMEM_LIMIT = 64 * 1024 * 1024  # safe on v5e/v6e (128 MiB phys) and v7x (64 MiB)


# ---------------------------------------------------------------------------
# Linear projection kernel: y = x @ W^T + b   (W^T pre-transposed, bf16)
# ---------------------------------------------------------------------------
def linear_kernel(x_ref, wt_ref, b_ref, o_ref):
    x = x_ref[...].astype(jnp.bfloat16)
    y = jnp.dot(x, wt_ref[...], preferred_element_type=jnp.float32)
    y = y + b_ref[...]                     # bias added in f32 after accumulation
    o_ref[...] = y.astype(o_ref.dtype)


def _linear(x, wt_bf16, b_f32, out_dtype, row_tile=256):
    B, N, Cin = x.shape
    Cout = wt_bf16.shape[1]
    tn = row_tile if (N >= row_tile and N % row_tile == 0) else N
    grid = (B, N // tn)
    return pl.pallas_call(
        linear_kernel,
        out_shape=jax.ShapeDtypeStruct((B, N, Cout), out_dtype),
        grid_spec=pltpu.PrefetchScalarGridSpec(
            num_scalar_prefetch=0,
            grid=grid,
            in_specs=[
                pl.BlockSpec((None, tn, Cin), lambda b, i: (b, i, 0)),   # x tile
                pl.BlockSpec((Cin, Cout), lambda b, i: (0, 0)),          # W^T (bf16)
                pl.BlockSpec((1, Cout), lambda b, i: (0, 0)),            # bias (f32)
            ],
            out_specs=pl.BlockSpec((None, tn, Cout), lambda b, i: (b, i, 0)),
        ),
        compiler_params=pltpu.CompilerParams(
            dimension_semantics=("parallel", "parallel"),
            vmem_limit_bytes=_VMEM_LIMIT),
    )(x, wt_bf16, b_f32)


# ---------------------------------------------------------------------------
# Scaled-dot-product attention kernel: one (batch, head, query-tile) per step.
# 1/sqrt(d) is already folded into the q projection.
# ---------------------------------------------------------------------------
def attn_kernel(q_ref, k_ref, v_ref, attn_ref, ctx_ref):
    f32 = jnp.float32
    # q_ref: (tq, d), k_ref/v_ref: (Nk, d)  — all bf16
    scores = jax.lax.dot_general(
        q_ref[...], k_ref[...],
        dimension_numbers=(((1,), (1,)), ((), ())),
        preferred_element_type=f32)                           # (tq, Nk) f32

    m = jnp.max(scores, axis=-1, keepdims=True)
    e = jnp.exp(scores - m)                                   # (tq, Nk) f32
    denom = jnp.sum(e, axis=-1, keepdims=True)                # (tq, 1)
    r = pl.reciprocal(denom, approx=True)                     # EUP slot

    # Normalized probabilities written straight out; PV runs on the
    # unnormalized e and the context is rescaled afterwards (one live temp).
    attn_ref[...] = (e * r).astype(attn_ref.dtype)

    ctx = jnp.dot(e.astype(jnp.bfloat16), v_ref[...],
                  preferred_element_type=f32)                 # (tq, d)
    ctx_ref[...] = (ctx * r).astype(ctx_ref.dtype)


def _attention(qh, kh, vh, attn_dtype, q_tile=128):
    B, H, Nq, d = qh.shape
    Nk = kh.shape[2]
    tq = q_tile if (Nq >= q_tile and Nq % q_tile == 0) else Nq
    grid = (B, H, Nq // tq)
    return pl.pallas_call(
        attn_kernel,
        out_shape=(
            jax.ShapeDtypeStruct((B, H, Nq, Nk), attn_dtype),     # probabilities
            jax.ShapeDtypeStruct((B, H, Nq, d), jnp.bfloat16),    # per-head context
        ),
        grid_spec=pltpu.PrefetchScalarGridSpec(
            num_scalar_prefetch=0,
            grid=grid,
            in_specs=[
                pl.BlockSpec((None, None, tq, d), lambda b, h, i: (b, h, i, 0)),
                pl.BlockSpec((None, None, Nk, d), lambda b, h, i: (b, h, 0, 0)),
                pl.BlockSpec((None, None, Nk, d), lambda b, h, i: (b, h, 0, 0)),
            ],
            out_specs=[
                pl.BlockSpec((None, None, tq, Nk), lambda b, h, i: (b, h, i, 0)),
                pl.BlockSpec((None, None, tq, d), lambda b, h, i: (b, h, i, 0)),
            ],
        ),
        compiler_params=pltpu.CompilerParams(
            dimension_semantics=("parallel", "parallel", "parallel"),
            vmem_limit_bytes=_VMEM_LIMIT),
    )(qh, kh, vh)


# ---------------------------------------------------------------------------
# Full module forward
# ---------------------------------------------------------------------------
def multi_head_attention(q, k, v, params, n_heads, q_tile=128, row_tile=256):
    """params = (wq, bq, wk, bk, wv, bv, wcat, bcat) in PyTorch nn.Linear layout."""
    wq, bq, wk, bk, wv, bv, wcat, bcat = params
    B, Nq, C = q.shape
    Nk = k.shape[1]
    H = n_heads
    assert C % H == 0
    d = C // H
    scale = 1.0 / (d ** 0.5)
    f32, bf16 = jnp.float32, jnp.bfloat16

    # Host-side weight prep: transpose once; fold 1/sqrt(d) into W_q/b_q in f32
    # BEFORE casting weights to bf16 (MXU-native). Biases stay f32.
    wqT = (wq.T.astype(f32) * scale).astype(bf16)
    wkT = wk.T.astype(bf16)
    wvT = wv.T.astype(bf16)
    wcT = wcat.T.astype(bf16)
    bq2 = (bq.astype(f32) * scale).reshape(1, C)
    bk2 = bk.astype(f32).reshape(1, C)
    bv2 = bv.astype(f32).reshape(1, C)
    bc2 = bcat.astype(f32).reshape(1, C)

    # 1) Projections — once per token (hoisted out of the attention grid).
    qp = _linear(q, wqT, bq2, bf16, row_tile)
    kp = _linear(k, wkT, bk2, bf16, row_tile)
    vp = _linear(v, wvT, bv2, bf16, row_tile)

    # 2) Split heads -> (B, H, N, d) so each attention step sees one head slice.
    qh = qp.reshape(B, Nq, H, d).transpose(0, 2, 1, 3)
    kh = kp.reshape(B, Nk, H, d).transpose(0, 2, 1, 3)
    vh = vp.reshape(B, Nk, H, d).transpose(0, 2, 1, 3)

    # 3) Attention.
    attn, ctx = _attention(qh, kh, vh, attn_dtype=q.dtype, q_tile=q_tile)

    # 4) Merge heads and apply the output projection.
    ctx2 = ctx.transpose(0, 2, 1, 3).reshape(B, Nq, C)
    out = _linear(ctx2, wcT, bc2, q.dtype, row_tile)
    return out, attn


# ---------------------------------------------------------------------------
# Pure-JAX reference mirroring the PyTorch forward exactly (f32 throughout).
# ---------------------------------------------------------------------------
def mha_reference(q, k, v, params, n_heads):
    wq, bq, wk, bk, wv, bv, wcat, bcat = params
    B, Nq, C = q.shape
    Nk = k.shape[1]
    d = C // n_heads

    def lin(x, w, b):
        return x @ w.T + b

    qh = lin(q, wq, bq).reshape(B, Nq, n_heads, d).transpose(0, 2, 1, 3)
    kh = lin(k, wk, bk).reshape(B, Nk, n_heads, d).transpose(0, 2, 1, 3)
    vh = lin(v, wv, bv).reshape(B, Nk, n_heads, d).transpose(0, 2, 1, 3)

    scores = (qh @ kh.transpose(0, 1, 3, 2)) / (d ** 0.5)
    attn = jax.nn.softmax(scores, axis=-1)
    ctx = attn @ vh
    ctx = ctx.transpose(0, 2, 1, 3).reshape(B, Nq, C)
    out = lin(ctx, wcat, bcat)
    return out, attn


if __name__ == "__main__":
    B, N, C, H = 2, 8, 32, 4

    key = jax.random.PRNGKey(0)
    keys = jax.random.split(key, 11)
    scale = 1.0 / (C ** 0.5)

    wq = jax.random.normal(keys[0], (C, C), jnp.float32) * scale
    bq = jax.random.normal(keys[1], (C,), jnp.float32) * scale
    wk = jax.random.normal(keys[2], (C, C), jnp.float32) * scale
    bk = jax.random.normal(keys[3], (C,), jnp.float32) * scale
    wv = jax.random.normal(keys[4], (C, C), jnp.float32) * scale
    bv = jax.random.normal(keys[5], (C,), jnp.float32) * scale
    wcat = jax.random.normal(keys[6], (C, C), jnp.float32) * scale
    bcat = jax.random.normal(keys[7], (C,), jnp.float32) * scale
    params = (wq, bq, wk, bk, wv, bv, wcat, bcat)

    q = jax.random.normal(keys[8], (B, N, C), jnp.float32)
    k = jax.random.normal(keys[9], (B, N, C), jnp.float32)
    v = jax.random.normal(keys[10], (B, N, C), jnp.float32)

    out, attn = multi_head_attention(q, k, v, params, H)
    out, attn = jax.block_until_ready((out, attn))

    out_ref, attn_ref = mha_reference(q, k, v, params, H)
    assert out.shape == (B, N, C) and attn.shape == (B, H, N, N)
    # bf16 MXU inputs + approx reciprocal -> loosened tolerance vs f32 reference.
    assert jnp.allclose(out, out_ref, atol=3e-2, rtol=3e-2), (
        float(jnp.max(jnp.abs(out - out_ref))))
    assert jnp.allclose(attn, attn_ref, atol=3e-2, rtol=3e-2), (
        float(jnp.max(jnp.abs(attn - attn_ref))))

    print("KERNEL_OK")
</pallas_src>

<mosaic_0001>
module attributes {stable_mosaic.version = 11 : i64} {
  func.func @linear_kernel(%arg0: i32, %arg1: i32, %arg2: memref<1x8x32xf32, #tpu.memory_space<vmem>>, %arg3: memref<32x32xbf16, #tpu.memory_space<vmem>>, %arg4: memref<1x32xf32, #tpu.memory_space<vmem>>, %arg5: memref<1x8x32xbf16, #tpu.memory_space<vmem>>) attributes {dimension_semantics = [#tpu.dimension_semantics<parallel>, #tpu.dimension_semantics<parallel>], iteration_bounds = array<i64: 2, 1>, scalar_prefetch = 0 : i64, scratch_operands = 0 : i64, tpu.core_type = #tpu.core_type<tc>, window_params = [{transform_indices = @transform_0, window_bounds = array<i64: 1, 8, 32>}, {pipeline_mode = #tpu.pipeline_mode<synchronous>, transform_indices = @transform_1, window_bounds = array<i64: 32, 32>}, {pipeline_mode = #tpu.pipeline_mode<synchronous>, transform_indices = @transform_2, window_bounds = array<i64: 1, 32>}, {transform_indices = @transform_3, window_bounds = array<i64: 1, 8, 32>}]} {
    %c0 = arith.constant 0 : index
    %c0_0 = arith.constant 0 : index
    %c0_1 = arith.constant 0 : index
    %0 = vector.load %arg2[%c0, %c0_0, %c0_1] : memref<1x8x32xf32, #tpu.memory_space<vmem>>, vector<1x8x32xf32>
    %1 = vector.shape_cast %0 : vector<1x8x32xf32> to vector<8x32xf32>
    %2 = arith.truncf %1 : vector<8x32xf32> to vector<8x32xbf16>
    %c0_2 = arith.constant 0 : index
    %c0_3 = arith.constant 0 : index
    %3 = vector.load %arg3[%c0_2, %c0_3] : memref<32x32xbf16, #tpu.memory_space<vmem>>, vector<32x32xbf16>
    %cst = arith.constant dense<0.000000e+00> : vector<8x32xf32>
    %4 = tpu.matmul %2, %3, %cst {dimension_numbers = #tpu.dot_dimension_numbers<[1], [0], [0], [1], [0, 0, 1, 1], [], []>} : vector<8x32xbf16>, vector<32x32xbf16>, vector<8x32xf32> -> vector<8x32xf32>
    %c0_4 = arith.constant 0 : index
    %c0_5 = arith.constant 0 : index
    %5 = vector.load %arg4[%c0_4, %c0_5] : memref<1x32xf32, #tpu.memory_space<vmem>>, vector<1x32xf32>
    %6 = vector.broadcast %5 : vector<1x32xf32> to vector<8x32xf32>
    %7 = arith.addf %4, %6 : vector<8x32xf32>
    %8 = arith.truncf %7 : vector<8x32xf32> to vector<8x32xbf16>
    %c0_6 = arith.constant 0 : index
    %c0_7 = arith.constant 0 : index
    %c0_8 = arith.constant 0 : index
    %9 = vector.load %arg5[%c0_6, %c0_7, %c0_8] : memref<1x8x32xbf16, #tpu.memory_space<vmem>>, vector<1x8x32xbf16>
    %10 = vector.shape_cast %9 : vector<1x8x32xbf16> to vector<8x32xbf16>
    %11 = vector.shape_cast %8 : vector<8x32xbf16> to vector<1x8x32xbf16>
    tpu.vector_store %arg5[%c0_6, %c0_7, %c0_8], %11 {strides = array<i32>} : memref<1x8x32xbf16, #tpu.memory_space<vmem>>, vector<1x8x32xbf16>,
    return
  }
  func.func @transform_0(%arg0: i32, %arg1: i32) -> (i32, i32, i32) {
    %c0_i32 = arith.constant 0 : i32
    %c0_i32_0 = arith.constant 0 : i32
    return %arg0, %arg1, %c0_i32 : i32, i32, i32
  }
  func.func @transform_1(%arg0: i32, %arg1: i32) -> (i32, i32) {
    %c0_i32 = arith.constant 0 : i32
    %c0_i32_0 = arith.constant 0 : i32
    %c0_i32_1 = arith.constant 0 : i32
    return %c0_i32, %c0_i32_0 : i32, i32
  }
  func.func @transform_2(%arg0: i32, %arg1: i32) -> (i32, i32) {
    %c0_i32 = arith.constant 0 : i32
    %c0_i32_0 = arith.constant 0 : i32
    %c0_i32_1 = arith.constant 0 : i32
    return %c0_i32, %c0_i32_0 : i32, i32
  }
  func.func @transform_3(%arg0: i32, %arg1: i32) -> (i32, i32, i32) {
    %c0_i32 = arith.constant 0 : i32
    %c0_i32_0 = arith.constant 0 : i32
    return %arg0, %arg1, %c0_i32 : i32, i32, i32
  }
}

</mosaic_0001>

<bundles_post_ra>
// kernel: tpu_custom_call.1
= control target key start
LH: loop header
LB: loop body
LE: loop exit
PB: predicated region body
PF: predicated region fallthrough
CT: control target
= control target key end

     0   :  { %8 = vsyncpa [#allocation3], 0  ;;  %s792_s0 = inlined_call_operand.hbm [shape: f32[2,8,32], index: 0, kind: input, shape index: {}]   ;;  %s793_s1 = inlined_call_operand.hbm [shape: bf16[32,32], index: 1, kind: input, shape index: {}]   ;;  %s794_s2 = inlined_call_operand.vmem [shape: f32[1,32], index: 2, kind: input, shape index: {}]   ;;  %s795_s3 = inlined_call_operand.hbm [shape: bf16[2,8,32], index: 3, kind: output, shape index: {}]  }
   0x1   :  { %10 = vsyncpa [#allocation3 + $0x1], 0 }
   0x2   :  { %11 = vsyncpa [#allocation6], 0 }
   0x3   :  { %12 = vsyncpa [#allocation4], 0 }
   0x4   :  { %14 = vsyncpa [#allocation4 + $0x1], 0  ;;  %s645_s12 = smov 0   ;;  %s647_s13 = smov 0  }
   0x5   :  { %s649_s14 = smov 0   ;;  %s651_s15 = smov 0  }
   0x6   :  { %s653_s16 = smov 0   ;;  %s655_s17 = smov 0  }
   0x7 LB: > { %s372_s18 = sadd.s32 4294967295, %s620_s17   ;;  %p374_p0 = scmp.ge.s32.totalorder %s620_s17, 1  ;;  %s620_s17 = sphi %s655_s17, %s20_s17   ;;  %s616_s16 = sphi %s653_s16, %s806_s16   ;;  %s612_s15 = sphi %s651_s15, %s805_s15   ;;  %s608_s14 = sphi %s649_s14, %s804_s14   ;;  %s604_s13 = sphi %s647_s13, %s803_s13   ;;  %s600_s12 = sphi %s645_s12, %s802_s12  }
   0x8   : > { %p677_p1 = scmp.eq.s32.totalorder %s372_s18, 0  ;;  %p135_p2 = scmp.lt.s32.totalorder %s620_s17, 3 }
   0x9   : > { %s146_s22 = sshll.u32 %s793_s1, 4  ;;  %s622_s24 = smov [#allocation5]   ;;  %s147_s22 = int_to_ptr.hbm [resolvable:$true] %s146_s22 }
   0xa   : > { %p685_p3 = pnand %p374_p0, %p135_p2  ;;  %s148_s25 = sshll.u32 %s622_s24, 4  ;;  %s149_s25 = int_to_ptr.vmem [resolvable:$true] %s148_s25 }
   0xb   : > { %p376_p6 = scmp.ge.s32.totalorder %s620_s17, 2  ;;  %s623_s26 = smov 64  }
   0xc   : > { %p406_p4 = pneg %p685_p3  ;;  %s624_s27 = smov 4  }
   0xd   : > { %s373_s28 = sadd.s32 4294967294, %s620_s17   ;;  %s32_s29 = sadd.s32 1, %s616_s16 }
   0xe   : > { %p407_p5 = pnand %p406_p4, %p677_p1  ;;  %s41_s30 = sadd.s32 1, %s608_s14 }
   0xf   : > { %p34_p7 = scmp.ge.s32.totalorder %s32_s29, 2  ;;  %p48_p8 = scmp.ne.s32.totalorder %s608_s14, %s604_s13 }
  0x10   : > { %409 = dma.hbm_to_vmem [thread:$0]  (!%p407_p5), %s147_s22, 256, %s149_s25, [#allocation6], %s623_s26, %s623_s26, %s624_s27  }
  0x11   : > { %p49_p9 = scmp.eq.s32.totalorder %s620_s17, 0  ;;  %p54_p10 = scmp.ne.s32.totalorder %s604_s13, %s600_s12 }
  0x12   : > { %s808_s29 = smov (%p34_p7, %s32_s29), 0  ;;  %p122_p13 = scmp.eq.s32.totalorder %s372_s18, 1 }
  0x13   : > { %p704_p11 = por %p49_p9, %p48_p8  ;;  %p710_p12 = por %p677_p1, %p54_p10 }
  0x14   : > { %s36_s6 = ssub.s32 %s616_s16, %s808_s29  ;;  %p128_p2 = scmp.eq.s32.totalorder %s373_s28, 1 }
  0x15   : > { %p39_p0 = scmp.eq.s32.totalorder %s36_s6, 0  ;;  %p716_p4 = por %p122_p13, %p48_p8 }
  0x16   : > { %p419_p5 = scmp.lt.s32.totalorder %s620_s17, 2  ;;  %p724_p7 = por %p128_p2, %p54_p10 }
  0x17   : > { %s722_s8 = scalar_select %p39_p0, %s608_s14, %s41_s30  }
  0x18   : > { %s165_s10 = sand.u32 1, %s608_s14   ;;  %s378_s20 = sshll.u32 %s616_s16, 3 }
  0x19   : > { %s377_s11 = sshll.u32 %s165_s10, 3  ;;  %s174_s18 = scalar_lea.hbm %s792_s0, %s378_s20 }
  0x1a   : > { %s169_s24 = scalar_lea.vmem [#allocation2], %s377_s11  ;;  %s176_s26 = sshll.u32 %s174_s18, 4  ;;  %s177_s26 = int_to_ptr.hbm [resolvable:$true] %s176_s26 }
  0x1b   : > { %s178_s25 = sshll.u32 %s169_s24, 4  ;;  %p411_p8 = pnand %p419_p5, %p704_p11  ;;  %s179_s25 = int_to_ptr.vmem [resolvable:$true] %s178_s25 }
  0x1c   : > { %s166_s27 = scalar_lea.sflag [#allocation3], %s165_s10  ;;  %187 = sbr.rel (%p685_p3) target bundleno = 178 (0xb2), region = 32 }
  0x1d   : > { %413 = dma.hbm_to_vmem [thread:$0]  (!%p411_p8), %s177_s26, 128, %s179_s25, %s166_s27  }
  0x1e   : > { %s738_s28 = sand.u32 (!%p685_p3), 1, %s604_s13  }
  0x1f   : > { %s380_s30 = sshll.u32 (!%p685_p3), %s738_s28, 3  ;;  %s190_s6 = scalar_lea.sflag (!%p685_p3), [#allocation3], %s738_s28 }
  0x20   : > { %s193_s11 = scalar_lea.vmem (!%p685_p3), [#allocation2], %s380_s30 }
  0x21   : > { %587 = dma.done.wait (%p710_p12), %s190_s6, 128  }
  0x22   : > { %589 = vsyncadd (%p710_p12), %s190_s6, 4294967168 }
  0x23   : > { %591 = dma.done.wait (%p677_p1), [#allocation6], 256  }
  0x24   : > { %593 = vsyncadd (%p677_p1), [#allocation6], 4294967040  ;;  %v397_v0 = vld [vmem:[#allocation5 + $0x8] sm:$0xff]  ;;  %v396_v1 = vld [vmem:[#allocation5] sm:$0xff]  ;;  %vm245_vm0 = vcmask 261120   ;;  %s382_s23 = sshll.u32 %s738_s28, 2 }
  0x25   : > { %255 = vmatpush.bf16.msra.mxu0 %v397_v0  ;;  %v223_v2 = vld [vmem:[%s193_s11] sm:$0xff]  ;;  %s393_s4 = sshll.u32 %s612_s15, 2  ;;  %s221_s22 = scalar_lea.vmem [#allocation7], %s382_s23  ;;  %vm263_vm1 = vcmask 257024  }
  0x26   : > { %v224_v3 = vpack.c.bf16 %v223_v2, %v223_v2  ;;  %v473_v4 = vld [vmem:[%s794_s2] ss:$0 sm:$0xff]  ;;  %s277_s21 = scalar_lea.hbm %s795_s3, %s393_s4  ;;  %s279_s18 = sshll.u32 %s221_s22, 4  ;;  %s280_s18 = int_to_ptr.vmem [resolvable:$true] %s279_s18 }
  0x27   : > { %s281_s24 = sshll.u32 %s277_s21, 4  ;;  %s266_s15 = scalar_lea.sflag [#allocation4], %s738_s28  ;;  %s282_s24 = int_to_ptr.hbm [resolvable:$true] %s281_s24 }
  0x28   : > { %s548_s25 = sshra.s32 %s282_s24, 4  ;;  %s554_s6 = scalar_lea.hbm %s795_s3, 8  ;;  %s549_s25 = int_to_ptr.hbm [resolvable:$true] %s548_s25 }
  0x29   : > { %256 = vmatpush.bf16.msra.mxu0 %v396_v1  ;;  %s550_s26 = scalar_lea.hbm %s549_s25, 4  ;;  %p555_p10 = scmp.lt.s32.totalorder %s549_s25, %s795_s3 }
  0x2a   : > { %p551_p1 = scmp.ne.s32.totalorder %s549_s25, %s550_s26  ;;  %p556_p11 = scmp.lt.s32.totalorder %s554_s6, %s550_s26 }
  0x2c   : > { %391 = vmatmul.msk.bf16.vlgmr.msra.gmra.mxu0 %vm245_vm0, %v224_v3  ;;  %p552_p3 = pnand %p551_p1, %p716_p4  ;;  %p557_p12 = por %p556_p11, %p555_p10 }
  0x2e   : > { %p553_p9 = pneg %p552_p3 }
  0x30   : > { %p558_p13 = pnand %p557_p12, %p553_p9 }
  0xa9   : > { %v258_v5 = vpop.f32.mrf.mxu0 }
  0xaa   : > { %v259_v6 = vadd.f32 %v473_v4, %v258_v5 }
  0xac   : > { %v262_v7 = vpack.c.bf16 %v259_v6, %v259_v6 }
  0xae   : > { %264 = vst.msk [vmem:[%s221_s22] sm:$0xf] %vm263_vm1, %v262_v7 }
  0xaf   : > { %561 = shalt.err (!%p558_p13)
}
  0xb0   : > { %404 = dma.vmem_to_hbm [thread:$0]  (%p716_p4), %s280_s18, 64, %s282_s24, %s266_s15  }
  0xb1   : > { %v260_v8 = vpop.f32.mrf.mxu0 }
  0xb2 PF: > { %s293_s28 = sand.u32 1, %s600_s12   ;;  %p415_p0 = pnand %p376_p6, %p724_p7 }
  0xb3   : > { %s294_s4 = scalar_lea.sflag [#allocation4], %s293_s28 }
  0xb4   : > { %p416_p2 = pneg %p415_p0 }
  0xb6   : > { %595 = dma.done.wait (%p416_p2), %s294_s4, 64  }
  0xb7   : > { %597 = vsyncadd (%p416_p2), %s294_s4, 4294967232  ;;  %s20_s17 = sadd.s32 1, %s620_s17   ;;  %s802_s12 = smov %s604_s13 }
  0xb8   : > { %p17_p5 = scmp.ge.s32.totalorder %s20_s17, 4   ;;  %s803_s13 = smov %s608_s14 }
  0xb9   : > { %s804_s14 = smov %s722_s8  ;;  %s805_s15 = smov %s616_s16 }
  0xba   : > { %s806_s16 = smov %s808_s29  ;;  %19 = sbr.rel (!%p17_p5) target bundleno = 7 (0x7), region = 81 }
  0xbf   :  { %300 = vsyncpa [#allocation3], 1 }
  0xc0   :  { %302 = vsyncpa [#allocation3 + $0x1], 1 }
  0xc1   :  { %303 = vsyncpa [#allocation6], 1 }
  0xc2   :  { %304 = vsyncpa [#allocation4], 1 }
  0xc3   :  { %306 = vsyncpa [#allocation4 + $0x1], 1 }

</bundles_post_ra>
